<compile_context>
chip_gen: v7x
topology: tpu7x:2x2x1
jax: 0.10.0
libtpu: 0.0.40
codegen_flags: <defaults>
</compile_context>

<pallas_src>
import functools

import jax
import jax.numpy as jnp
from jax.experimental import pallas as pl
from jax.experimental.pallas import tpu as pltpu


# ---------------------------------------------------------------------------
# Kernel
# ---------------------------------------------------------------------------
def _layernorm_kernel(x_ref, gamma_ref, beta_ref, o_ref, *, eps, d_model, d_pad):
    x = x_ref[...].astype(jnp.float32)                    # (tile_rows, d_pad)
    # Padded lanes (if any) were zero-filled in the wrapper, so a plain sum over
    # the padded width divided by the *logical* d_model is the exact mean.
    mean = jnp.sum(x, axis=-1, keepdims=True) * (1.0 / d_model)
    diff = x - mean
    if d_pad != d_model:
        # Mask the padded lanes out of the variance (they'd contribute mean^2).
        lane = jax.lax.broadcasted_iota(jnp.int32, (1, d_pad), 1)
        diff = jnp.where(lane < d_model, diff, 0.0)
    # Unbiased variance (ddof=1), like torch.std default; constant multiply.
    ddof_scale = 1.0 / max(d_model - 1, 1)                # guard d_model == 1
    var = jnp.sum(diff * diff, axis=-1, keepdims=True) * ddof_scale
    std = jnp.sqrt(var)
    # One reciprocal per row (EUP) instead of a per-lane divide; approx=False
    # keeps parity within 1e-5 of the reference divide.
    inv = pl.reciprocal(std + eps, approx=False)
    out = diff * inv                                      # padded lanes stay 0
    gamma = gamma_ref[...]                                # (1, d_pad), f32
    beta = beta_ref[...]                                  # (1, d_pad), f32
    o_ref[...] = (gamma * out + beta).astype(o_ref.dtype)


# ---------------------------------------------------------------------------
# Host-side sizing helpers
# ---------------------------------------------------------------------------
def _cdiv(a, b):
    return -(-a // b)


def _round_up(a, b):
    return _cdiv(a, b) * b


def _tpu_generation():
    """Best-effort TPU generation (5 / 6 / 7); defaults to 6 if unknown."""
    try:
        kind = jax.devices()[0].device_kind.lower()
    except Exception:  # pragma: no cover - defensive
        return 6
    if "v7" in kind or "tpu7" in kind:
        return 7
    if "v6" in kind:
        return 6
    if "v5" in kind:
        return 5
    return 6


# Total VMEM working-set target per generation (bytes). Chosen so the
# double-buffered blocks PLUS the f32 in-kernel temporaries fit with headroom:
#   v5e -> ~512 rows @ d=1024 f32, v6e -> ~768 rows, v7x -> ~1456 rows.
_WORKING_SET_TARGET = {
    5: 14 * 1024 * 1024,
    6: 21 * 1024 * 1024,
    7: 40 * 1024 * 1024,
}


def _per_row_vmem_bytes(d_pad, itemsize):
    # 2x double-buffered input block + 2x double-buffered output block (HBM
    # dtype) + ~3 f32 temporaries (cast x, diff, out) the compiler materializes.
    return d_pad * (2 * itemsize + 2 * itemsize + 3 * 4)


def _pick_tile_rows(n_rows, d_pad, itemsize, sublane):
    target = _WORKING_SET_TARGET.get(_tpu_generation(), _WORKING_SET_TARGET[6])
    per_row = _per_row_vmem_bytes(d_pad, itemsize)
    rows = max(sublane, target // max(1, per_row))
    rows = (rows // sublane) * sublane                   # dtype-aware sublane align

    rows_full = _round_up(n_rows, sublane)
    if rows_full > sublane and rows >= rows_full:
        # Keep at least 2 grid blocks so the "parallel" axis can be sharded
        # across TensorCores (2 TCs on v7x / megacore in general).
        half = _round_up(_cdiv(n_rows, 2), sublane)
        rows = min(rows, max(sublane, half))
    rows = max(sublane, min(rows, rows_full))
    return rows


def _vmem_limit_bytes(tile_rows, d_pad, itemsize):
    block = tile_rows * d_pad * itemsize                 # one in or out block
    temps = 3 * tile_rows * d_pad * 4                    # f32 intermediates
    params = 2 * 2 * d_pad * 4                           # gamma/beta, buffered
    total = 2 * (block + block) + temps + params + (2 << 20)  # +2 MiB headroom
    total = max(total, 16 << 20)                         # never below default
    total = min(total, 56 << 20)                         # stay under v7x 64 MiB
    return int(total)


# ---------------------------------------------------------------------------
# Wrapper
# ---------------------------------------------------------------------------
def layer_norm(x, gamma, beta, eps=1e-12, tile_rows=None):
    """x: (..., d_model); gamma, beta: (d_model,)."""
    orig_shape = x.shape
    d_model = orig_shape[-1]
    x2 = x.reshape(-1, d_model)
    n_rows = x2.shape[0]

    # Lane-dense feature axis: pad to a multiple of 128 so the kernel's stores
    # are unmasked; padded lanes are masked out of the stats and sliced off.
    d_pad = _round_up(d_model, 128)
    feat_pad = d_pad - d_model
    if feat_pad:
        x2 = jnp.pad(x2, ((0, 0), (0, feat_pad)))

    itemsize = jnp.dtype(x.dtype).itemsize
    sublane = {4: 8, 2: 16, 1: 32}.get(itemsize, 8)

    if tile_rows is None:
        tile_rows = _pick_tile_rows(n_rows, d_pad, itemsize, sublane)

    # Pre-cast params to f32 (and pad) once; constant index_map keeps them
    # VMEM-resident across the whole grid (no per-step re-DMA).
    gamma2 = gamma.astype(jnp.float32).reshape(1, d_model)
    beta2 = beta.astype(jnp.float32).reshape(1, d_model)
    if feat_pad:
        gamma2 = jnp.pad(gamma2, ((0, 0), (0, feat_pad)))
        beta2 = jnp.pad(beta2, ((0, 0), (0, feat_pad)))

    grid = (pl.cdiv(n_rows, tile_rows),)  # ragged last block handled by Pallas

    # TODO(synk): pl.Buffered(3) on the streaming specs is a possible few-%
    # win once VMEM headroom is confirmed on the target generation; left at the
    # default double-buffering here.
    out = pl.pallas_call(
        functools.partial(_layernorm_kernel, eps=eps, d_model=d_model, d_pad=d_pad),
        out_shape=jax.ShapeDtypeStruct((n_rows, d_pad), x.dtype),
        grid_spec=pltpu.PrefetchScalarGridSpec(
            num_scalar_prefetch=0,
            grid=grid,
            in_specs=[
                pl.BlockSpec((tile_rows, d_pad), lambda i: (i, 0)),
                pl.BlockSpec((1, d_pad), lambda i: (0, 0)),
                pl.BlockSpec((1, d_pad), lambda i: (0, 0)),
            ],
            out_specs=pl.BlockSpec((tile_rows, d_pad), lambda i: (i, 0)),
        ),
        compiler_params=pltpu.CompilerParams(
            dimension_semantics=("parallel",),
            vmem_limit_bytes=_vmem_limit_bytes(tile_rows, d_pad, itemsize),
        ),
    )(x2, gamma2, beta2)

    if feat_pad:
        out = out[:, :d_model]
    return out.reshape(orig_shape)


# ---------------------------------------------------------------------------
# Pure-JAX reference matching the PyTorch module exactly
# ---------------------------------------------------------------------------
def layer_norm_ref(x, gamma, beta, eps=1e-12):
    xf = x.astype(jnp.float32)
    mean = jnp.mean(xf, axis=-1, keepdims=True)
    var = jnp.var(xf, axis=-1, keepdims=True, ddof=1)
    std = jnp.sqrt(var)
    out = (xf - mean) / (std + eps)
    return (gamma * out + beta).astype(x.dtype)


if __name__ == "__main__":
    key = jax.random.PRNGKey(0)

    # Shapes consistent with the transformer module: (batch, seq, d_model).
    batch, seq, d_model = 2, 8, 32
    x = jax.random.normal(key, (batch, seq, d_model), dtype=jnp.float32)
    gamma = jnp.ones((d_model,), dtype=jnp.float32)   # nn.Parameter(torch.ones)
    beta = jnp.zeros((d_model,), dtype=jnp.float32)   # nn.Parameter(torch.zeros)

    y = jax.block_until_ready(layer_norm(x, gamma, beta))
    y_ref = layer_norm_ref(x, gamma, beta)
    assert y.shape == x.shape
    assert jnp.allclose(y, y_ref, atol=1e-5, rtol=1e-5), "mismatch (padded path)"

    # Also exercise the lane-aligned (d_model % 128 == 0) fast path.
    d_model2 = 128
    x2 = jax.random.normal(jax.random.PRNGKey(1), (batch, seq, d_model2),
                           dtype=jnp.float32)
    g2 = jnp.ones((d_model2,), dtype=jnp.float32)
    b2 = jnp.zeros((d_model2,), dtype=jnp.float32)
    y2 = jax.block_until_ready(layer_norm(x2, g2, b2))
    y2_ref = layer_norm_ref(x2, g2, b2)
    assert jnp.allclose(y2, y2_ref, atol=1e-5, rtol=1e-5), "mismatch (dense path)"

    print("KERNEL_OK")
</pallas_src>

<mosaic_0001>
module attributes {stable_mosaic.version = 11 : i64} {
  func.func @_layernorm_kernel(%arg0: i32, %arg1: memref<8x128xf32, #tpu.memory_space<vmem>>, %arg2: memref<1x128xf32, #tpu.memory_space<vmem>>, %arg3: memref<1x128xf32, #tpu.memory_space<vmem>>, %arg4: memref<8x128xf32, #tpu.memory_space<vmem>>) attributes {dimension_semantics = [#tpu.dimension_semantics<parallel>], iteration_bounds = array<i64: 2>, scalar_prefetch = 0 : i64, scratch_operands = 0 : i64, tpu.core_type = #tpu.core_type<tc>, window_params = [{transform_indices = @transform_0, window_bounds = array<i64: 8, 128>}, {pipeline_mode = #tpu.pipeline_mode<synchronous>, transform_indices = @transform_1, window_bounds = array<i64: 1, 128>}, {pipeline_mode = #tpu.pipeline_mode<synchronous>, transform_indices = @transform_2, window_bounds = array<i64: 1, 128>}, {transform_indices = @transform_3, window_bounds = array<i64: 8, 128>}]} {
    %c0 = arith.constant 0 : index
    %c0_0 = arith.constant 0 : index
    %0 = vector.load %arg1[%c0, %c0_0] : memref<8x128xf32, #tpu.memory_space<vmem>>, vector<8x128xf32>
    %cst = arith.constant dense<0.000000e+00> : vector<8xf32>
    %1 = vector.multi_reduction <add>, %0, %cst [1] : vector<8x128xf32> to vector<8xf32>
    %2 = vector.shape_cast %1 : vector<8xf32> to vector<8x1xf32>
    %cst_1 = arith.constant 3.125000e-02 : f32
    %3 = vector.broadcast %cst_1 : f32 to vector<8x1xf32>
    %4 = arith.mulf %2, %3 : vector<8x1xf32>
    %5 = vector.broadcast %4 : vector<8x1xf32> to vector<8x128xf32>
    %6 = arith.subf %0, %5 : vector<8x128xf32>
    %7 = tpu.iota {dimensions = array<i32: 1>} : vector<1x128xi32>
    %c32_i32 = arith.constant 32 : i32
    %8 = vector.broadcast %c32_i32 : i32 to vector<1x128xi32>
    %9 = arith.cmpi slt, %7, %8 : vector<1x128xi32>
    %cst_2 = arith.constant 0.000000e+00 : f32
    %10 = vector.shape_cast %9 : vector<1x128xi1> to vector<1x128xi1>
    %11 = vector.broadcast %10 : vector<1x128xi1> to vector<8x128xi1>
    %12 = vector.broadcast %cst_2 : f32 to vector<8x128xf32>
    %13 = arith.select %11, %6, %12 : vector<8x128xi1>, vector<8x128xf32>
    %14 = arith.mulf %13, %13 : vector<8x128xf32>
    %cst_3 = arith.constant dense<0.000000e+00> : vector<8xf32>
    %15 = vector.multi_reduction <add>, %14, %cst_3 [1] : vector<8x128xf32> to vector<8xf32>
    %16 = vector.shape_cast %15 : vector<8xf32> to vector<8x1xf32>
    %cst_4 = arith.constant 0.0322580636 : f32
    %17 = vector.broadcast %cst_4 : f32 to vector<8x1xf32>
    %18 = arith.mulf %16, %17 : vector<8x1xf32>
    %19 = math.sqrt %18 : vector<8x1xf32>
    %cst_5 = arith.constant 9.99999996E-13 : f32
    %20 = vector.broadcast %cst_5 : f32 to vector<8x1xf32>
    %21 = arith.addf %19, %20 : vector<8x1xf32>
    %22 = tpu.reciprocal %21 : vector<8x1xf32> -> vector<8x1xf32>
    %23 = vector.broadcast %22 : vector<8x1xf32> to vector<8x128xf32>
    %24 = arith.mulf %13, %23 : vector<8x128xf32>
    %c0_6 = arith.constant 0 : index
    %c0_7 = arith.constant 0 : index
    %25 = vector.load %arg2[%c0_6, %c0_7] : memref<1x128xf32, #tpu.memory_space<vmem>>, vector<1x128xf32>
    %c0_8 = arith.constant 0 : index
    %c0_9 = arith.constant 0 : index
    %26 = vector.load %arg3[%c0_8, %c0_9] : memref<1x128xf32, #tpu.memory_space<vmem>>, vector<1x128xf32>
    %27 = vector.broadcast %25 : vector<1x128xf32> to vector<8x128xf32>
    %28 = arith.mulf %27, %24 : vector<8x128xf32>
    %29 = vector.broadcast %26 : vector<1x128xf32> to vector<8x128xf32>
    %30 = arith.addf %28, %29 : vector<8x128xf32>
    %c0_10 = arith.constant 0 : index
    %c0_11 = arith.constant 0 : index
    %31 = vector.load %arg4[%c0_10, %c0_11] : memref<8x128xf32, #tpu.memory_space<vmem>>, vector<8x128xf32>
    tpu.vector_store %arg4[%c0_10, %c0_11], %30 {strides = array<i32>} : memref<8x128xf32, #tpu.memory_space<vmem>>, vector<8x128xf32>,
    return
  }
  func.func @transform_0(%arg0: i32) -> (i32, i32) {
    %c0_i32 = arith.constant 0 : i32
    %c0_i32_0 = arith.constant 0 : i32
    return %arg0, %c0_i32 : i32, i32
  }
  func.func @transform_1(%arg0: i32) -> (i32, i32) {
    %c0_i32 = arith.constant 0 : i32
    %c0_i32_0 = arith.constant 0 : i32
    %c0_i32_1 = arith.constant 0 : i32
    return %c0_i32, %c0_i32_0 : i32, i32
  }
  func.func @transform_2(%arg0: i32) -> (i32, i32) {
    %c0_i32 = arith.constant 0 : i32
    %c0_i32_0 = arith.constant 0 : i32
    %c0_i32_1 = arith.constant 0 : i32
    return %c0_i32, %c0_i32_0 : i32, i32
  }
  func.func @transform_3(%arg0: i32) -> (i32, i32) {
    %c0_i32 = arith.constant 0 : i32
    %c0_i32_0 = arith.constant 0 : i32
    return %arg0, %c0_i32 : i32, i32
  }
}

</mosaic_0001>

<bundles_post_ra>
// kernel: tpu_custom_call.1
= control target key start
LH: loop header
LB: loop body
LE: loop exit
PB: predicated region body
PF: predicated region fallthrough
CT: control target
= control target key end

     0   :  { %8 = vsyncpa [#allocation3], 0  ;;  %s667_s0 = inlined_call_operand.hbm [shape: f32[16,128], index: 0, kind: input, shape index: {}]   ;;  %s668_s1 = inlined_call_operand.vmem [shape: f32[1,128], index: 1, kind: input, shape index: {}]   ;;  %s669_s2 = inlined_call_operand.vmem [shape: f32[1,128], index: 2, kind: input, shape index: {}]   ;;  %s670_s3 = inlined_call_operand.hbm [shape: f32[16,128], index: 3, kind: output, shape index: {}]  }
   0x1   :  { %10 = vsyncpa [#allocation3 + $0x1], 0 }
   0x2   :  { %11 = vsyncpa [#allocation4], 0 }
   0x3   :  { %13 = vsyncpa [#allocation4 + $0x1], 0  ;;  %s496_s12 = smov 0   ;;  %s498_s13 = smov 0  }
   0x4   :  { %s500_s14 = smov 0   ;;  %s502_s15 = smov 0  }
   0x5 LB: > { %s517_s16 = sadd.s32 4294967295, %s472_s15   ;;  %s312_s17 = sadd.s32 4294967294, %s472_s15   ;;  %s472_s15 = sphi %s502_s15, %s685_s15   ;;  %s468_s14 = sphi %s500_s14, %s684_s14   ;;  %s464_s13 = sphi %s498_s13, %s683_s13   ;;  %s460_s12 = sphi %s496_s12, %s682_s12  }
   0x6   : > { %s521_s18 = sadd.s32 1, %s472_s15   ;;  %s26_s19 = sadd.s32 1, %s468_s14 }
   0x7   : > { %s23_s20 = ssub.s32 %s472_s15, %s521_s18  ;;  %p33_p0 = scmp.ne.s32.totalorder %s468_s14, %s464_s13 }
   0x8   : > { %p24_p1 = scmp.eq.s32.totalorder %s23_s20, 0  ;;  %p34_p2 = scmp.eq.s32.totalorder %s472_s15, 0 }
   0x9   : > { %p39_p3 = scmp.ne.s32.totalorder %s464_s13, %s460_s12  ;;  %p40_p4 = scmp.eq.s32.totalorder %s517_s16, 0 }
   0xa   : > { %s533_s21 = scalar_select %p24_p1, %s468_s14, %s26_s19  }
   0xb   : > { %p535_p5 = por %p34_p2, %p33_p0  ;;  %p539_p6 = por %p40_p4, %p39_p3 }
   0xc   : > { %p105_p7 = scmp.eq.s32.totalorder %s517_s16, 1  ;;  %p111_p8 = scmp.eq.s32.totalorder %s312_s17, 1 }
   0xd   : > { %p338_p10 = scmp.lt.s32.totalorder %s472_s15, 2  ;;  %s137_s26 = sand.u32 1, %s468_s14  }
   0xe   : > { %p546_p11 = por %p105_p7, %p33_p0  ;;  %p550_p12 = por %p111_p8, %p39_p3 }
   0xf   : > { %s316_s27 = sshll.u32 %s472_s15, 7  ;;  %s315_s28 = sshll.u32 %s137_s26, 3 }
  0x10   : > { %s674_s24 = scalar_select %p546_p11, 1, 0 }
  0x11   : > { %s675_s25 = scalar_select %p550_p12, 1, 0 }
  0x12   : > { %s559_s4 = scalar_lea.hbm %s667_s0, %s316_s27  ;;  %s141_s5 = scalar_lea.vmem [#allocation2], %s315_s28 }
  0x13   : > { %s148_s6 = sshll.u32 %s141_s5, 4  ;;  %p563_p13 = pnand %p338_p10, %p535_p5  ;;  %s567_s6 = int_to_ptr.vmem [resolvable:$true] %s148_s6 }
  0x14   : > { %s138_s8 = scalar_lea.sflag [#allocation3], %s137_s26  ;;  %s376_s9 = scalar_lea.hbm %s559_s4, 128 }
  0x15   : > { %p377_p2 = scmp.ne.s32.totalorder %s559_s4, %s376_s9  ;;  %p378_p3 = pneg %p563_p13 }
  0x16   : > { %s381_s17 = scalar_lea.hbm %s667_s0, 256  ;;  %p382_p5 = scmp.lt.u32.totalorder %s559_s4, %s667_s0 }
  0x17   : > { %p379_p4 = pnand %p378_p3, %p377_p2  ;;  %p383_p8 = scmp.lt.u32.totalorder %s381_s17, %s376_s9 }
  0x18   : > { %p385_p9 = scmp.lt.u32.totalorder %s376_s9, %s559_s4 }
  0x19   : > { %p380_p7 = pneg %p379_p4  ;;  %p384_p10 = por %p383_p8, %p382_p5 }
  0x1b   : > { %p386_p0 = por %p385_p9, %p384_p10 }
  0x1d   : > { %p387_p1 = pnand %p386_p0, %p380_p7 }
  0x1f   : > { %390 = shalt.err (!%p387_p1)
}
  0x20   : > { %s391_s22 = scalar_lea.vmem %s567_s6, 128  ;;  %s474_s26 = smov [#allocation2]  }
  0x21   : > { %p392_p2 = scmp.ne.s32.totalorder %s567_s6, %s391_s22  ;;  %s396_s27 = sshll.u32 %s474_s26, 4  ;;  %s397_s27 = int_to_ptr.vmem [resolvable:$false] %s396_s27 }
  0x22   : > { %s398_s28 = scalar_lea.vmem %s397_s27, 256  ;;  %p399_p11 = scmp.lt.s32.totalorder %s567_s6, %s397_s27 }
  0x23   : > { %p394_p4 = pnand %p392_p2, %p378_p3  ;;  %p400_p5 = scmp.lt.s32.totalorder %s398_s28, %s391_s22 }
  0x25   : > { %p395_p12 = pneg %p394_p4  ;;  %p401_p8 = por %p400_p5, %p399_p11 }
  0x27   : > { %p402_p9 = pnand %p401_p8, %p395_p12 }
  0x29   : > { %405 = shalt.err (!%p402_p9)
}
  0x2a   : > { %333 = dma.hbm_to_vmem [thread:$0]  (!%p563_p13), %s559_s4, 128, %s567_s6, %s138_s8  }
  0x2b   : > { %p677_p0 = scmp.lt.s32.totalorder %s472_s15, 3  ;;  %p678_p1 = scmp.ge.s32.totalorder %s472_s15, 1 }
  0x2d   : > { %p154_p3 = pnand %p678_p1, %p677_p0 }
  0x2e   : > { %s601_s29 = sand.u32 (!%p154_p3), 1, %s464_s13  }
  0x2f   : > { %157 = sbr.rel (%p154_p3) target bundleno = 397 (0x18d), region = 32  ;;  %s318_s30 = sshll.u32 (!%p154_p3), %s601_s29, 3 }
  0x30   : > { %s160_s5 = scalar_lea.sflag (!%p154_p3), [#allocation3], %s601_s29  ;;  %s163_s7 = scalar_lea.vmem (!%p154_p3), [#allocation2], %s318_s30 }
  0x36   : > { %451 = dma.done.wait (%p539_p6), %s160_s5, 128  }
  0x37   : > { %453 = vsyncadd (%p539_p6), %s160_s5, 4294967168  ;;  %v186_v0 = vld [vmem:[%s163_s7] sm:$0xff]  ;;  %v191_v1 = vlaneseq  ;;  %s323_s9 = sshll.u32 %s517_s16, 7  ;;  %s185_s10 = scalar_lea.vmem [#allocation5], %s318_s30 }
  0x38   : > { %187 = vadd.xlane.f32.xlu0 %v186_v0  ;;  %v320_v17 = vld [vmem:[%s668_s1] ss:$0 sm:$0xff]  ;;  %s242_s11 = sshll.u32 %s185_s10, 4  ;;  %s623_s20 = scalar_lea.hbm %s670_s3, %s323_s9  ;;  %s625_s11 = int_to_ptr.vmem [resolvable:$true] %s242_s11 }
  0x39   : > { %v192_v2 = vand.u32 127, %v191_v1  ;;  %v321_v19 = vld [vmem:[%s669_s2] ss:$0 sm:$0xff]  ;;  %s229_s22 = scalar_lea.sflag [#allocation4], %s601_s29  ;;  %s406_s26 = scalar_lea.vmem %s625_s11, 128 }
  0x3a   : > { %p407_p6 = scmp.ne.s32.totalorder %s625_s11, %s406_s26  ;;  %p679_p11 = scmp.ne.s32.totalorder %s674_s24, 0 }
  0x3b   : > { %vm193_vm0 = vcmp.lt.s32.totalorder %v192_v2, 32  ;;  %s475_s16 = smov [#allocation5]  }
  0x3c   : > { %p408_p12 = pnand %p407_p6, %p679_p11  ;;  %s410_s27 = sshll.u32 %s475_s16, 4  ;;  %s411_s27 = int_to_ptr.vmem [resolvable:$false] %s410_s27 }
  0x3d   : > { %s412_s28 = scalar_lea.vmem %s411_s27, 256  ;;  %p413_p7 = scmp.lt.s32.totalorder %s625_s11, %s411_s27 }
  0x3e   : > { %p409_p13 = pneg %p408_p12  ;;  %p414_p10 = scmp.lt.s32.totalorder %s412_s28, %s406_s26 }
  0x40   : > { %p415_p2 = por %p414_p10, %p413_p7 }
  0x42   : > { %p416_p4 = pnand %p415_p2, %p409_p13 }
  0xc5   : > { %v188_v3 = vpop.xlane.xlu0 %187 }
  0xc6   : > { %v189_v4 = vmul.f32 0.03125, %v188_v3 }
  0xc8   : > { %v190_v5 = vsub.f32 %v186_v0, %v189_v4 }
  0xca   : > { %v196_v6 = vsel %vm193_vm0, %v190_v5, 0.0 }
  0xcb   : > { %v197_v7 = vmul.f32 %v196_v6, %v196_v6 }
  0xcd   : > { %198 = vadd.xlane.f32.xlu0 %v197_v7 }
 0x15a   : > { %v199_v8 = vpop.xlane.xlu0 %198 }
 0x15b   : > { %v200_v9 = vmul.f32 0.032258064, %v199_v8 }
 0x15d   : > { %372 = vrsqrt.f32 %v200_v9  ;;  %vm203_vm1 = vcmp.eq.f32.partialorder %v200_v9, inf  ;;  %v206_v12 = vand.u32 2147483648, %v200_v9  ;;  %vm205_vm2 = vcmp.eq.f32.partialorder %v200_v9, 0.0 }
 0x167   : > { %v373_v10 = vpop.eup %372 }
 0x168   : > { %v202_v11 = vmul.f32 %v373_v10, %v200_v9 }
 0x16a   : > { %v204_v13 = vsel %vm203_vm1, %v200_v9, %v202_v11 }
 0x16b   : > { %v207_v14 = vsel %vm205_vm2, %v206_v12, %v204_v13 }
 0x16c   : > { %v208_v15 = vadd.f32 1e-12, %v207_v14 }
 0x16e   : > { %374 = vrcp.f32 %v208_v15 }
 0x178   : > { %v375_v16 = vpop.eup %374 }
 0x179   : > { %v210_v18 = vmul.f32 %v375_v16, %v196_v6 }
 0x17b   : > { %v219_v20 = vmul.f32 %v320_v17, %v210_v18 }
 0x17d   : > { %v226_v21 = vadd.f32 %v321_v19, %v219_v20 }
 0x17f   : > { %227 = vst [vmem:[%s185_s10] sm:$0xff] %v226_v21 }
 0x180   : > { %419 = shalt.err (!%p416_p4)
}
 0x181   : > { %s420_s29 = scalar_lea.hbm %s623_s20, 128  ;;  %s424_s7 = scalar_lea.hbm %s670_s3, 256 }
 0x182   : > { %p421_p5 = scmp.ne.s32.totalorder %s623_s20, %s420_s29  ;;  %p425_p0 = scmp.lt.u32.totalorder %s623_s20, %s670_s3 }
 0x183   : > { %p426_p1 = scmp.lt.u32.totalorder %s424_s7, %s420_s29  ;;  %p428_p6 = scmp.lt.u32.totalorder %s420_s29, %s623_s20 }
 0x184   : > { %p422_p8 = pnand %p421_p5, %p679_p11 }
 0x185   : > { %p427_p3 = por %p426_p1, %p425_p0 }
 0x186   : > { %p423_p9 = pneg %p422_p8 }
 0x187   : > { %p429_p12 = por %p428_p6, %p427_p3 }
 0x189   : > { %p430_p13 = pnand %p429_p12, %p423_p9 }
 0x18b   : > { %433 = shalt.err (!%p430_p13)
}
 0x18c   : > { %328 = dma.vmem_to_hbm [thread:$0]  (%p679_p11), %s625_s11, 128, %s623_s20, %s229_s22  }
 0x18d PF: > { %s254_s6 = sand.u32 1, %s460_s12   ;;  %p680_p7 = scmp.ne.s32.totalorder %s675_s25, 0 }
 0x18e   : > { %p681_p10 = scmp.ge.s32.totalorder %s472_s15, 2  ;;  %s255_s8 = scalar_lea.sflag [#allocation4], %s254_s6 }
 0x190   : > { %p335_p2 = pnand %p681_p10, %p680_p7 }
 0x192   : > { %455 = dma.done.wait (!%p335_p2), %s255_s8, 128  }
 0x193   : > { %457 = vsyncadd (!%p335_p2), %s255_s8, 4294967168  ;;  %p16_p4 = scmp.ge.s32.totalorder %s521_s18, 4   ;;  %s682_s12 = smov %s464_s13 }
 0x194   : > { %s683_s13 = smov %s468_s14  ;;  %s684_s14 = smov %s533_s21 }
 0x195   : > { %s685_s15 = smov %s521_s18  ;;  %18 = sbr.rel (!%p16_p4) target bundleno = 5 (0x5), region = 77 }
 0x19c   :  { %260 = vsyncpa [#allocation3], 1 }
 0x19d   :  { %262 = vsyncpa [#allocation3 + $0x1], 1 }
 0x19e   :  { %263 = vsyncpa [#allocation4], 1 }
 0x19f   :  { %265 = vsyncpa [#allocation4 + $0x1], 1 }

</bundles_post_ra>
